<compile_context>
chip_gen: v7x
topology: tpu7x:2x2x1
jax: 0.10.0
libtpu: 0.0.40
codegen_flags: <defaults>
</compile_context>

<pallas_src>
import functools

import jax
import jax.numpy as jnp
from jax.experimental import pallas as pl
from jax.experimental.pallas import tpu as pltpu


def _leaky_relu(x, slope=0.2):
    return jnp.where(x >= 0, x, slope * x)


def _round_up(n, m):
    return ((n + m - 1) // m) * m


def resblock_kernel(x_ref, w1_ref, w2p_ref, b_ref, o_ref, *, K, P, L):
    """Fused ResBlock for one batch element (NCL layout, length on lanes).

    x_ref   : (1, Cin_p, Le)              zero-padded input; data at lanes [2P, 2P+L)
    w1_ref  : (Cout_p, K*Cin_p)           conv1 taps, column index = k*Cin_p + c
    w2p_ref : (Cout_p, K*Cout_p + Cin_p)  [conv2 taps | 1x1 projection]
    b_ref   : (Cout_p, 2)                 [b1 | b2 + bproj]
    o_ref   : (1, Cout_p, Le)             output; valid at lanes [2P, 2P+L)
    """
    x = x_ref[0]                      # (Cin_p, Le)
    Le = x.shape[1]

    bb = b_ref[...]                   # (Cout_p, 2)
    b1 = bb[:, 0:1]                   # (Cout_p, 1)
    b2p = bb[:, 1:2]                  # (Cout_p, 1)  -- b2 + bproj

    def taps(a):
        # Row block k holds `a` shifted so lane q carries a[:, q - P + k].
        # Lane wrap-around only lands in padding lanes, which are masked /
        # cropped, so a cyclic roll (XLU) is safe.
        parts = []
        for k in range(K):
            s = (P - k) % Le
            parts.append(a if s == 0 else pltpu.roll(a, s, 1))
        return jnp.concatenate(parts, axis=0)

    # ---- conv1: single MXU matmul over the K*Cin contraction ----
    h = jnp.dot(w1_ref[...], taps(x), preferred_element_type=jnp.float32) + b1
    h = _leaky_relu(h)

    # Zero the halo lanes so h doubles as conv2's zero-padded input (this also
    # kills any roll wrap-around garbage).  Replaces the old VMEM scratch.
    q = jax.lax.broadcasted_iota(jnp.int32, h.shape, 1)
    h = jnp.where(jnp.logical_and(q >= 2 * P, q < 2 * P + L), h, 0.0)

    # ---- conv2 + 1x1 residual projection fused into ONE matmul ----
    z = jnp.concatenate([taps(h), x], axis=0)        # (K*Cout_p + Cin_p, Le)
    y = jnp.dot(w2p_ref[...], z, preferred_element_type=jnp.float32) + b2p
    o_ref[0] = _leaky_relu(y)


def resblock_pallas(x_ncl, w1_sn, b1, w2_sn, b2, wp_sn=None, bp=None, *,
                    kernel_size, stride=1, padding=None):
    """x_ncl: (B, Cin, L) f32.  w*_sn: PyTorch-layout (Cout, Cin, K) spectral-
    normalized weights.  Returns (B, Cout, L)."""
    B, Cin, L = x_ncl.shape
    K = kernel_size
    P = K // 2 if padding is None else padding
    Cout = w1_sn.shape[0]
    assert stride == 1 and P == K // 2, (
        "ResBlock residual add requires stride=1 and padding=kernel_size//2")

    if wp_sn is None:                 # no projection branch (Cin == Cout)
        assert Cin == Cout
        wp_sn = jnp.eye(Cout, dtype=x_ncl.dtype)[:, :, None]
        bp = jnp.zeros((Cout,), x_ncl.dtype)

    # TPU-friendly padded sizes: channels to sublane multiples (8), length to a
    # lane multiple (128) so activations / output are lane-dense.
    Cin_p = _round_up(Cin, 8)
    Cout_p = _round_up(Cout, 8)
    Le = _round_up(L + 4 * P, 128)

    # Single wrapper pad, still NCL; real data occupies lanes [2P, 2P+L).
    x_ext = jnp.pad(x_ncl, ((0, 0), (0, Cin_p - Cin), (2 * P, Le - L - 2 * P)))

    # ---- pack weights once (tiny, wrapper-side) ----
    def tap_major(w, ci, ci_p):
        # (Cout, ci, K) -> (Cout_p, K*ci_p), column index = k*ci_p + c
        w = jnp.transpose(w, (0, 2, 1))                                # (Cout, K, ci)
        w = jnp.pad(w, ((0, Cout_p - Cout), (0, 0), (0, ci_p - ci)))
        return w.reshape(Cout_p, K * ci_p)

    w1_cat = tap_major(w1_sn, Cin, Cin_p)                              # (Cout_p, K*Cin_p)
    w2_cat = tap_major(w2_sn, Cout, Cout_p)                            # (Cout_p, K*Cout_p)
    wp_mat = jnp.pad(wp_sn[:, :, 0],
                     ((0, Cout_p - Cout), (0, Cin_p - Cin)))           # (Cout_p, Cin_p)
    w2p_cat = jnp.concatenate([w2_cat, wp_mat], axis=1)                # conv2 | proj

    b1_p = jnp.pad(b1, (0, Cout_p - Cout)).reshape(Cout_p, 1)
    b2p_p = jnp.pad(b2 + bp, (0, Cout_p - Cout)).reshape(Cout_p, 1)
    b_cat = jnp.concatenate([b1_p, b2p_p], axis=1)                     # (Cout_p, 2)

    kern = functools.partial(resblock_kernel, K=K, P=P, L=L)

    out_ext = pl.pallas_call(
        kern,
        out_shape=jax.ShapeDtypeStruct((B, Cout_p, Le), jnp.float32),
        grid_spec=pltpu.PrefetchScalarGridSpec(
            num_scalar_prefetch=0,
            grid=(B,),
            in_specs=[
                pl.BlockSpec((1, Cin_p, Le), lambda b: (b, 0, 0)),
                pl.BlockSpec((Cout_p, K * Cin_p), lambda b: (0, 0)),
                pl.BlockSpec((Cout_p, K * Cout_p + Cin_p), lambda b: (0, 0)),
                pl.BlockSpec((Cout_p, 2), lambda b: (0, 0)),
            ],
            out_specs=pl.BlockSpec((1, Cout_p, Le), lambda b: (b, 0, 0)),
        ),
        compiler_params=pltpu.CompilerParams(
            dimension_semantics=("parallel",)),
    )(x_ext, w1_cat, w2p_cat, b_cat)

    # Crop channel / length padding (already NCL; no transposes anywhere).
    return out_ext[:, :Cout, 2 * P:2 * P + L]


# ---------------- parameter setup / reference (plain JAX glue) ----------------

def spectral_normalize(w_pt, key, n_power_iterations=1, eps=1e-12):
    """Mimic torch.nn.utils.spectral_norm: divide by the approx top singular
    value of the (Cout, Cin*K) weight matrix via power iteration."""
    cout = w_pt.shape[0]
    w_mat = w_pt.reshape(cout, -1)
    u = jax.random.normal(key, (cout,), jnp.float32)
    u = u / (jnp.linalg.norm(u) + eps)
    v = None
    for _ in range(n_power_iterations):
        v = w_mat.T @ u
        v = v / (jnp.linalg.norm(v) + eps)
        u = w_mat @ v
        u = u / (jnp.linalg.norm(u) + eps)
    sigma = u @ (w_mat @ v)
    return w_pt / sigma


def _conv1d_ref(x, w_pt, b, pad):
    # x: (B, Cin, L), w_pt: (Cout, Cin, K) -- pure-JAX reference
    y = jax.lax.conv_general_dilated(
        x, w_pt, window_strides=(1,), padding=[(pad, pad)],
        dimension_numbers=("NCH", "OIH", "NCH"))
    return y + b[None, :, None]


if __name__ == "__main__":
    key = jax.random.PRNGKey(0)
    B, Cin, Cout, L = 2, 4, 8, 16      # Cin != Cout -> projection branch active
    K, stride, pad = 3, 1, 1

    ks = jax.random.split(key, 10)
    x = jax.random.normal(ks[0], (B, Cin, L), jnp.float32)

    # PyTorch-layout weights (Cout, Cin, K), deterministic synthetic init.
    w1_pt = jax.random.normal(ks[1], (Cout, Cin, K), jnp.float32) * 0.3
    b1 = jax.random.normal(ks[2], (Cout,), jnp.float32) * 0.1
    w2_pt = jax.random.normal(ks[3], (Cout, Cout, K), jnp.float32) * 0.3
    b2 = jax.random.normal(ks[4], (Cout,), jnp.float32) * 0.1
    wp_pt = jax.random.normal(ks[5], (Cout, Cin, 1), jnp.float32) * 0.3
    bp = jax.random.normal(ks[6], (Cout,), jnp.float32) * 0.1

    w1_sn = spectral_normalize(w1_pt, ks[7])
    w2_sn = spectral_normalize(w2_pt, ks[8])
    wp_sn = spectral_normalize(wp_pt, ks[9])

    out = resblock_pallas(x, w1_sn, b1, w2_sn, b2, wp_sn, bp,
                          kernel_size=K, stride=stride, padding=pad)
    out = jax.block_until_ready(out)
    assert out.shape == (B, Cout, L)

    # Pure-JAX reference of the same forward (spectral-normalized weights).
    h_pre = _conv1d_ref(x, w1_sn, b1, pad)
    h_ref = jnp.where(h_pre >= 0, h_pre, 0.2 * h_pre)
    y_ref = _conv1d_ref(h_ref, w2_sn, b2, pad)
    y0_ref = _conv1d_ref(x, wp_sn, bp, 0)
    s = y0_ref + y_ref
    ref = jnp.where(s >= 0, s, 0.2 * s)

    assert jnp.allclose(out, ref, atol=1e-2, rtol=1e-2), "mismatch vs reference"
    print("KERNEL_OK")
</pallas_src>

<mosaic_0001>
module attributes {stable_mosaic.version = 11 : i64} {
  func.func @resblock_kernel(%arg0: i32, %arg1: memref<1x8x128xf32, #tpu.memory_space<vmem>>, %arg2: memref<8x24xf32, #tpu.memory_space<vmem>>, %arg3: memref<8x32xf32, #tpu.memory_space<vmem>>, %arg4: memref<8x2xf32, #tpu.memory_space<vmem>>, %arg5: memref<1x8x128xf32, #tpu.memory_space<vmem>>) attributes {dimension_semantics = [#tpu.dimension_semantics<parallel>], iteration_bounds = array<i64: 2>, scalar_prefetch = 0 : i64, scratch_operands = 0 : i64, tpu.core_type = #tpu.core_type<tc>, window_params = [{transform_indices = @transform_0, window_bounds = array<i64: 1, 8, 128>}, {pipeline_mode = #tpu.pipeline_mode<synchronous>, transform_indices = @transform_1, window_bounds = array<i64: 8, 24>}, {pipeline_mode = #tpu.pipeline_mode<synchronous>, transform_indices = @transform_2, window_bounds = array<i64: 8, 32>}, {pipeline_mode = #tpu.pipeline_mode<synchronous>, transform_indices = @transform_3, window_bounds = array<i64: 8, 2>}, {transform_indices = @transform_4, window_bounds = array<i64: 1, 8, 128>}]} {
    %c0 = arith.constant 0 : index
    %c0_0 = arith.constant 0 : index
    %c0_1 = arith.constant 0 : index
    %0 = vector.load %arg1[%c0, %c0_0, %c0_1] : memref<1x8x128xf32, #tpu.memory_space<vmem>>, vector<1x8x128xf32>
    %1 = vector.shape_cast %0 : vector<1x8x128xf32> to vector<8x128xf32>
    %c0_2 = arith.constant 0 : index
    %c0_3 = arith.constant 0 : index
    %2 = vector.load %arg4[%c0_2, %c0_3] : memref<8x2xf32, #tpu.memory_space<vmem>>, vector<8x2xf32>
    %3 = vector.extract_strided_slice %2 {offsets = [0, 0], sizes = [8, 1], strides = [1, 1]} : vector<8x2xf32> to vector<8x1xf32>
    %4 = vector.extract_strided_slice %2 {offsets = [0, 1], sizes = [8, 1], strides = [1, 1]} : vector<8x2xf32> to vector<8x1xf32>
    %c0_4 = arith.constant 0 : index
    %c0_5 = arith.constant 0 : index
    %5 = vector.load %arg2[%c0_4, %c0_5] : memref<8x24xf32, #tpu.memory_space<vmem>>, vector<8x24xf32>
    %c1_i32 = arith.constant 1 : i32
    %6 = tpu.dynamic_rotate %1 by %c1_i32 dim 1 : vector<8x128xf32>, i32 -> vector<8x128xf32>
    %c127_i32 = arith.constant 127 : i32
    %7 = tpu.dynamic_rotate %1 by %c127_i32 dim 1 : vector<8x128xf32>, i32 -> vector<8x128xf32>
    %8 = tpu.concatenate %6, %1, %7 in 0 : vector<8x128xf32>, vector<8x128xf32>, vector<8x128xf32> -> vector<24x128xf32>
    %cst = arith.constant dense<0.000000e+00> : vector<8x128xf32>
    %9 = tpu.matmul %5, %8, %cst {dimension_numbers = #tpu.dot_dimension_numbers<[1], [0], [0], [1], [0, 0, 1, 1], [], []>} : vector<8x24xf32>, vector<24x128xf32>, vector<8x128xf32> -> vector<8x128xf32>
    %10 = vector.broadcast %3 : vector<8x1xf32> to vector<8x128xf32>
    %11 = arith.addf %9, %10 : vector<8x128xf32>
    %cst_6 = arith.constant 0.000000e+00 : f32
    %12 = vector.broadcast %cst_6 : f32 to vector<8x128xf32>
    %13 = arith.cmpf oge, %11, %12 : vector<8x128xf32>
    %cst_7 = arith.constant 2.000000e-01 : f32
    %14 = vector.broadcast %cst_7 : f32 to vector<8x128xf32>
    %15 = arith.mulf %14, %11 : vector<8x128xf32>
    %16 = arith.select %13, %11, %15 : vector<8x128xi1>, vector<8x128xf32>
    %17 = tpu.iota {dimensions = array<i32: 1>} : vector<8x128xi32>
    %c2_i32 = arith.constant 2 : i32
    %18 = vector.broadcast %c2_i32 : i32 to vector<8x128xi32>
    %19 = arith.cmpi sge, %17, %18 : vector<8x128xi32>
    %c18_i32 = arith.constant 18 : i32
    %20 = vector.broadcast %c18_i32 : i32 to vector<8x128xi32>
    %21 = arith.cmpi slt, %17, %20 : vector<8x128xi32>
    %22 = arith.andi %19, %21 : vector<8x128xi1>
    %cst_8 = arith.constant 0.000000e+00 : f32
    %23 = vector.broadcast %cst_8 : f32 to vector<8x128xf32>
    %24 = arith.select %22, %16, %23 : vector<8x128xi1>, vector<8x128xf32>
    %c1_i32_9 = arith.constant 1 : i32
    %25 = tpu.dynamic_rotate %24 by %c1_i32_9 dim 1 : vector<8x128xf32>, i32 -> vector<8x128xf32>
    %c127_i32_10 = arith.constant 127 : i32
    %26 = tpu.dynamic_rotate %24 by %c127_i32_10 dim 1 : vector<8x128xf32>, i32 -> vector<8x128xf32>
    %27 = tpu.concatenate %25, %24, %26 in 0 : vector<8x128xf32>, vector<8x128xf32>, vector<8x128xf32> -> vector<24x128xf32>
    %28 = tpu.concatenate %27, %1 in 0 : vector<24x128xf32>, vector<8x128xf32> -> vector<32x128xf32>
    %c0_11 = arith.constant 0 : index
    %c0_12 = arith.constant 0 : index
    %29 = vector.load %arg3[%c0_11, %c0_12] : memref<8x32xf32, #tpu.memory_space<vmem>>, vector<8x32xf32>
    %cst_13 = arith.constant dense<0.000000e+00> : vector<8x128xf32>
    %30 = tpu.matmul %29, %28, %cst_13 {dimension_numbers = #tpu.dot_dimension_numbers<[1], [0], [0], [1], [0, 0, 1, 1], [], []>} : vector<8x32xf32>, vector<32x128xf32>, vector<8x128xf32> -> vector<8x128xf32>
    %31 = vector.broadcast %4 : vector<8x1xf32> to vector<8x128xf32>
    %32 = arith.addf %30, %31 : vector<8x128xf32>
    %cst_14 = arith.constant 0.000000e+00 : f32
    %33 = vector.broadcast %cst_14 : f32 to vector<8x128xf32>
    %34 = arith.cmpf oge, %32, %33 : vector<8x128xf32>
    %cst_15 = arith.constant 2.000000e-01 : f32
    %35 = vector.broadcast %cst_15 : f32 to vector<8x128xf32>
    %36 = arith.mulf %35, %32 : vector<8x128xf32>
    %37 = arith.select %34, %32, %36 : vector<8x128xi1>, vector<8x128xf32>
    %c0_16 = arith.constant 0 : index
    %c0_17 = arith.constant 0 : index
    %c0_18 = arith.constant 0 : index
    %38 = vector.load %arg5[%c0_16, %c0_17, %c0_18] : memref<1x8x128xf32, #tpu.memory_space<vmem>>, vector<1x8x128xf32>
    %39 = vector.shape_cast %38 : vector<1x8x128xf32> to vector<8x128xf32>
    %40 = vector.shape_cast %37 : vector<8x128xf32> to vector<1x8x128xf32>
    tpu.vector_store %arg5[%c0_16, %c0_17, %c0_18], %40 {strides = array<i32>} : memref<1x8x128xf32, #tpu.memory_space<vmem>>, vector<1x8x128xf32>,
    return
  }
  func.func @transform_0(%arg0: i32) -> (i32, i32, i32) {
    %c0_i32 = arith.constant 0 : i32
    %c0_i32_0 = arith.constant 0 : i32
    %c0_i32_1 = arith.constant 0 : i32
    return %arg0, %c0_i32, %c0_i32_0 : i32, i32, i32
  }
  func.func @transform_1(%arg0: i32) -> (i32, i32) {
    %c0_i32 = arith.constant 0 : i32
    %c0_i32_0 = arith.constant 0 : i32
    %c0_i32_1 = arith.constant 0 : i32
    return %c0_i32, %c0_i32_0 : i32, i32
  }
  func.func @transform_2(%arg0: i32) -> (i32, i32) {
    %c0_i32 = arith.constant 0 : i32
    %c0_i32_0 = arith.constant 0 : i32
    %c0_i32_1 = arith.constant 0 : i32
    return %c0_i32, %c0_i32_0 : i32, i32
  }
  func.func @transform_3(%arg0: i32) -> (i32, i32) {
    %c0_i32 = arith.constant 0 : i32
    %c0_i32_0 = arith.constant 0 : i32
    %c0_i32_1 = arith.constant 0 : i32
    return %c0_i32, %c0_i32_0 : i32, i32
  }
  func.func @transform_4(%arg0: i32) -> (i32, i32, i32) {
    %c0_i32 = arith.constant 0 : i32
    %c0_i32_0 = arith.constant 0 : i32
    %c0_i32_1 = arith.constant 0 : i32
    return %arg0, %c0_i32, %c0_i32_0 : i32, i32, i32
  }
}

</mosaic_0001>

<bundles_post_ra>
// kernel: tpu_custom_call.1
= control target key start
LH: loop header
LB: loop body
LE: loop exit
PB: predicated region body
PF: predicated region fallthrough
CT: control target
= control target key end

     0   :  { %9 = vsyncpa [#allocation3], 0  ;;  %s899_s0 = inlined_call_operand.hbm [shape: f32[2,8,128], index: 0, kind: input, shape index: {}]   ;;  %s900_s1 = inlined_call_operand.vmem [shape: f32[8,24], index: 1, kind: input, shape index: {}]   ;;  %s901_s2 = inlined_call_operand.vmem [shape: f32[8,32], index: 2, kind: input, shape index: {}]   ;;  %s902_s3 = inlined_call_operand.vmem [shape: f32[8,2], index: 3, kind: input, shape index: {}]   ;;  %s903_s4 = inlined_call_operand.hbm [shape: f32[2,8,128], index: 4, kind: output, shape index: {}]  }
   0x1   :  { %11 = vsyncpa [#allocation3 + $0x1], 0 }
   0x2   :  { %12 = vsyncpa [#allocation4], 0 }
   0x3   :  { %14 = vsyncpa [#allocation4 + $0x1], 0  ;;  %s723_s15 = smov 0   ;;  %s725_s16 = smov 0  }
   0x4   :  { %s727_s17 = smov 0   ;;  %s729_s18 = smov 0  }
   0x5 LB: > { %s744_s19 = sadd.s32 4294967295, %s686_s18   ;;  %s479_s20 = sadd.s32 4294967294, %s686_s18   ;;  %s686_s18 = sphi %s729_s18, %s918_s18   ;;  %s682_s17 = sphi %s727_s17, %s917_s17   ;;  %s678_s16 = sphi %s725_s16, %s916_s16   ;;  %s674_s15 = sphi %s723_s15, %s915_s15  }
   0x6   : > { %s748_s21 = sadd.s32 1, %s686_s18   ;;  %s27_s22 = sadd.s32 1, %s682_s17 }
   0x7   : > { %s24_s23 = ssub.s32 %s686_s18, %s748_s21  ;;  %p34_p0 = scmp.ne.s32.totalorder %s682_s17, %s678_s16 }
   0x8   : > { %p25_p1 = scmp.eq.s32.totalorder %s24_s23, 0  ;;  %p35_p2 = scmp.eq.s32.totalorder %s686_s18, 0 }
   0x9   : > { %p40_p3 = scmp.ne.s32.totalorder %s678_s16, %s674_s15  ;;  %p41_p4 = scmp.eq.s32.totalorder %s744_s19, 0 }
   0xa   : > { %s760_s24 = scalar_select %p25_p1, %s682_s17, %s27_s22  }
   0xb   : > { %p762_p5 = por %p35_p2, %p34_p0  ;;  %p766_p6 = por %p41_p4, %p40_p3 }
   0xc   : > { %p127_p7 = scmp.eq.s32.totalorder %s744_s19, 1  ;;  %p133_p8 = scmp.eq.s32.totalorder %s479_s20, 1 }
   0xd   : > { %p545_p10 = scmp.lt.s32.totalorder %s686_s18, 2  ;;  %s162_s29 = sand.u32 1, %s682_s17  }
   0xe   : > { %p773_p11 = por %p127_p7, %p34_p0  ;;  %p777_p12 = por %p133_p8, %p40_p3 }
   0xf   : > { %s483_s30 = sshll.u32 %s686_s18, 7  ;;  %s482_s5 = sshll.u32 %s162_s29, 3 }
  0x10   : > { %s907_s27 = scalar_select %p773_p11, 1, 0 }
  0x11   : > { %s908_s28 = scalar_select %p777_p12, 1, 0 }
  0x12   : > { %s786_s8 = scalar_lea.hbm %s899_s0, %s483_s30  ;;  %s166_s9 = scalar_lea.vmem [#allocation2], %s482_s5 }
  0x13   : > { %s173_s10 = sshll.u32 %s166_s9, 4  ;;  %p790_p13 = pnand %p545_p10, %p762_p5  ;;  %s794_s10 = int_to_ptr.vmem [resolvable:$true] %s173_s10 }
  0x14   : > { %s163_s12 = scalar_lea.sflag [#allocation3], %s162_s29  ;;  %s590_s13 = scalar_lea.hbm %s786_s8, 128 }
  0x15   : > { %p591_p2 = scmp.ne.s32.totalorder %s786_s8, %s590_s13  ;;  %p592_p3 = pneg %p790_p13 }
  0x16   : > { %s595_s22 = scalar_lea.hbm %s899_s0, 256  ;;  %p596_p5 = scmp.lt.u32.totalorder %s786_s8, %s899_s0 }
  0x17   : > { %p593_p4 = pnand %p592_p3, %p591_p2  ;;  %p597_p8 = scmp.lt.u32.totalorder %s595_s22, %s590_s13 }
  0x18   : > { %p599_p9 = scmp.lt.u32.totalorder %s590_s13, %s786_s8 }
  0x19   : > { %p594_p7 = pneg %p593_p4  ;;  %p598_p10 = por %p597_p8, %p596_p5 }
  0x1b   : > { %p600_p0 = por %p599_p9, %p598_p10 }
  0x1d   : > { %p601_p1 = pnand %p600_p0, %p594_p7 }
  0x1f   : > { %604 = shalt.err (!%p601_p1)
}
  0x20   : > { %s605_s29 = scalar_lea.vmem %s794_s10, 128  ;;  %s688_s30 = smov [#allocation2]  }
  0x21   : > { %p606_p2 = scmp.ne.s32.totalorder %s794_s10, %s605_s29  ;;  %s610_s5 = sshll.u32 %s688_s30, 4  ;;  %s611_s5 = int_to_ptr.vmem [resolvable:$false] %s610_s5 }
  0x22   : > { %s612_s6 = scalar_lea.vmem %s611_s5, 256  ;;  %p613_p11 = scmp.lt.s32.totalorder %s794_s10, %s611_s5 }
  0x23   : > { %p608_p4 = pnand %p606_p2, %p592_p3  ;;  %p614_p5 = scmp.lt.s32.totalorder %s612_s6, %s605_s29 }
  0x25   : > { %p609_p12 = pneg %p608_p4  ;;  %p615_p8 = por %p614_p5, %p613_p11 }
  0x27   : > { %p616_p9 = pnand %p615_p8, %p609_p12 }
  0x29   : > { %619 = shalt.err (!%p616_p9)
}
  0x2a   : > { %540 = dma.hbm_to_vmem [thread:$0]  (!%p790_p13), %s786_s8, 128, %s794_s10, %s163_s12  }
  0x2b   : > { %p910_p0 = scmp.lt.s32.totalorder %s686_s18, 3  ;;  %p911_p1 = scmp.ge.s32.totalorder %s686_s18, 1 }
  0x2d   : > { %p179_p3 = pnand %p911_p1, %p910_p0 }
  0x2e   : > { %s828_s7 = sand.u32 (!%p179_p3), 1, %s678_s16  }
  0x2f   : > { %182 = sbr.rel (%p179_p3) target bundleno = 753 (0x2f1), region = 36  ;;  %s485_s9 = sshll.u32 (!%p179_p3), %s828_s7, 3 }
  0x30   : > { %s185_s13 = scalar_lea.sflag (!%p179_p3), [#allocation3], %s828_s7  ;;  %s188_s11 = scalar_lea.vmem (!%p179_p3), [#allocation2], %s485_s9 }
  0x36   : > { %665 = dma.done.wait (%p766_p6), %s185_s13, 128  }
  0x37   : > { %667 = vsyncadd (%p766_p6), %s185_s13, 4294967168  ;;  %v689_v0 = vmov 0.0|0.0   ;;  %vm690_vm0 = vmmov 0   ;;  %v691_v1 = vmov 0.0   ;;  %v692_v2 = vmov 0   ;;  %v213_v3 = vld [vmem:[%s188_s11] sm:$0xff] }
  0x38   : > { %523 = vmatprep.subr.bf16.mxu0 %v689_v0  ;;  %509 = vmatprep.mubr.msk.f32.mxu0 %vm690_vm0, %v691_v1  ;;  %v214_v4 = vld [vmem:[%s902_s3] sm:$0xff]  ;;  %s693_s12 = smov 1   ;;  %s694_s26 = smov 127   ;;  %vm225_vm1 = vcmask 195584   ;;  %v302_v9 = vlaneseq  ;;  %v695_v16 = vmov 1   ;;  %vm696_vm6 = vmmov 1  }
  0x39   : > { %526 = vmatprep.subr.bf16.mxu1 %v689_v0  ;;  %520 = vmatprep.mubr.msk.f32.mxu1 %vm690_vm0, %v691_v1  ;;  %v215_v8 = vld [vmem:[%s900_s1] sm:$0xff]  ;;  %vm317_vm8 = vcmask 261120   ;;  %s491_s25 = sshll.u32 %s744_s19, 7  ;;  %s212_s29 = scalar_lea.vmem [#allocation5], %s485_s9 }
  0x3a   : > { %587 = vset.pattern.permute.xlu1 %v692_v2  ;;  %216 = vrot.lane.b32.xlu0 %v213_v3, %s693_s12  ;;  %v303_v10 = vand.u32 127, %v302_v9  ;;  %v312_v23 = vld [vmem:[%s901_s2] sm:$0xff]  ;;  %s409_s30 = sshll.u32 %s212_s29, 4  ;;  %s855_s13 = scalar_lea.hbm %s903_s4, %s491_s25  ;;  %s857_s30 = int_to_ptr.vmem [resolvable:$true] %s409_s30 }
  0x3b   : > { %222 = vperm.xlu1 %587, %v214_v4   ;;  %589 = vset.pattern.permute.xlu0 %v695_v16  ;;  %s396_s11 = scalar_lea.sflag [#allocation4], %s828_s7  ;;  %s620_s8 = scalar_lea.vmem %s857_s30, 128 }
  0x3c   : > { %vm304_vm2 = vcmp.ge.s32.totalorder %v303_v10, 2  ;;  %vm305_vm3 = vcmp.lt.s32.totalorder %v303_v10, 18  ;;  %p621_p6 = scmp.ne.s32.totalorder %s857_s30, %s620_s8  ;;  %p912_p11 = scmp.ne.s32.totalorder %s907_s27, 0 }
  0x3d   : > { %vm306_vm5 = vmand %vm304_vm2, %vm305_vm3  ;;  %s697_s19 = smov [#allocation5]  }
  0x3e   : > { %218 = vrot.lane.b32.xlu0 %v213_v3, %s694_s26  ;;  %vm528_vm7 = vmpackc.low %vm306_vm5, %vm696_vm6  ;;  %p622_p12 = pnand %p621_p6, %p912_p11  ;;  %s624_s9 = sshll.u32 %s697_s19, 4  ;;  %s625_s9 = int_to_ptr.vmem [resolvable:$false] %s624_s9 }
  0x3f   : > { %588 = vset.pattern.permute.xlu1 %v695_v16  ;;  %s626_s10 = scalar_lea.vmem %s625_s9, 256  ;;  %p627_p7 = scmp.lt.s32.totalorder %s857_s30, %s625_s9 }
  0x40   : > { %p623_p13 = pneg %p622_p12  ;;  %p628_p10 = scmp.lt.s32.totalorder %s626_s10, %s620_s8 }
  0x42   : > { %p629_p2 = por %p628_p10, %p627_p7 }
  0x44   : > { %p630_p4 = pnand %p629_p2, %p623_p13 }
  0xac   : > { %v217_v5 = vpop.permute.xlu0 %216 }
  0xad   : > { %v524_v6 = vpack.c.bf16 %v213_v3, %v217_v5 }
  0xaf   : > { %525 = vmatpush3.bf16.msra.mxu0 %v524_v6 }
  0xb0   : > { %507 = vmatprep.subr.mxu0 %v691_v1  ;;  %v219_v7 = vpop.permute.xlu0 %218 }
  0xb3   : > { %508 = vmatpush3.msra.mxu0 %v219_v7 }
  0xb4   : > { %510 = vmatmul.mubr.msk.f32.vlgmr.msra.gmra.mrb[0].mxu0 %vm225_vm1, %v215_v8 }
  0xba   : > { %v223_v11 = vpop.permute.xlu1 %222 }
 0x187   : > { %v295_v12 = vpop.f32.mrb[0].mxu0 }
 0x188   : > { %v296_v13 = vadd.f32 %v295_v12, %v223_v11  ;;  %v511_v14 = vpop.f32.mrb[1].mxu0 }
 0x18a   : > { %v300_v15 = vmul.f32 0.2, %v296_v13  ;;  %vm299_vm4 = vcmp.ge.f32.partialorder %v296_v13, 0.0 }
 0x18c   : > { %v301_v17 = vsel %vm299_vm4, %v296_v13, %v300_v15 }
 0x18d   : > { %v307_v18 = vsel %vm306_vm5, %v301_v17, 0.0 }
 0x18e   : > { %310 = vrot.lane.b32.xlu0 %v307_v18, %s694_s26  ;;  %308 = vrot.lane.b32.xlu1 %v307_v18, %s693_s12 }
 0x192   : > { %314 = vperm.xlu1 %588, %v214_v4  }
 0x200   : > { %v309_v19 = vpop.permute.xlu1 %308  ;;  %v311_v21 = vpop.permute.xlu0 %310 }
 0x201   : > { %v527_v20 = vpack.c.bf16 %v301_v17, %v309_v19  ;;  %v531_v22 = vpack.c.bf16 %v213_v3, %v311_v21 }
 0x203   : > { %529 = vmatpush3.bf16.msk.msra.mxu1 %vm528_vm7, %v527_v20 }
 0x204   : > { %530 = vmatprep.subr.bf16.mxu1 %v689_v0 }
 0x207   : > { %532 = vmatpush3.bf16.msra.mxu1 %v531_v22 }
 0x20a   : > { %521 = vmatmul.mubr.msk.f32.vlgmr.msra.gmra.mrb[0].mxu1 %vm317_vm8, %v312_v23 }
 0x211   : > { %v315_v24 = vpop.permute.xlu1 %314 }
 0x2dd   : > { %v387_v25 = vpop.f32.mrb[0].mxu1 }
 0x2de   : > { %v388_v26 = vadd.f32 %v387_v25, %v315_v24  ;;  %v522_v27 = vpop.f32.mrb[1].mxu1 }
 0x2e0   : > { %vm391_vm9 = vcmp.ge.f32.partialorder %v388_v26, 0.0  ;;  %v392_v28 = vmul.f32 0.2, %v388_v26 }
 0x2e2   : > { %v393_v29 = vsel %vm391_vm9, %v388_v26, %v392_v28 }
 0x2e3   : > { %394 = vst [vmem:[%s212_s29] sm:$0xff] %v393_v29 }
 0x2e4   : > { %633 = shalt.err (!%p630_p4)
}
 0x2e5   : > { %s634_s7 = scalar_lea.hbm %s855_s13, 128  ;;  %s638_s14 = scalar_lea.hbm %s903_s4, 256 }
 0x2e6   : > { %p635_p5 = scmp.ne.s32.totalorder %s855_s13, %s634_s7  ;;  %p639_p0 = scmp.lt.u32.totalorder %s855_s13, %s903_s4 }
 0x2e7   : > { %p640_p1 = scmp.lt.u32.totalorder %s638_s14, %s634_s7  ;;  %p642_p6 = scmp.lt.u32.totalorder %s634_s7, %s855_s13 }
 0x2e8   : > { %p636_p8 = pnand %p635_p5, %p912_p11 }
 0x2e9   : > { %p641_p3 = por %p640_p1, %p639_p0 }
 0x2ea   : > { %p637_p9 = pneg %p636_p8 }
 0x2eb   : > { %p643_p12 = por %p642_p6, %p641_p3 }
 0x2ed   : > { %p644_p13 = pnand %p643_p12, %p637_p9 }
 0x2ef   : > { %647 = shalt.err (!%p644_p13)
}
 0x2f0   : > { %535 = dma.vmem_to_hbm [thread:$0]  (%p912_p11), %s857_s30, 128, %s855_s13, %s396_s11  }
 0x2f1 PF: > { %s421_s23 = sand.u32 1, %s674_s15   ;;  %p913_p7 = scmp.ne.s32.totalorder %s908_s28, 0 }
 0x2f2   : > { %p914_p10 = scmp.ge.s32.totalorder %s686_s18, 2  ;;  %s422_s25 = scalar_lea.sflag [#allocation4], %s421_s23 }
 0x2f4   : > { %p542_p2 = pnand %p914_p10, %p913_p7 }
 0x2f6   : > { %669 = dma.done.wait (!%p542_p2), %s422_s25, 128  }
 0x2f7   : > { %671 = vsyncadd (!%p542_p2), %s422_s25, 4294967168  ;;  %p17_p4 = scmp.ge.s32.totalorder %s748_s21, 4   ;;  %s915_s15 = smov %s678_s16 }
 0x2f8   : > { %s916_s16 = smov %s682_s17  ;;  %s917_s17 = smov %s760_s24 }
 0x2f9   : > { %s918_s18 = smov %s748_s21  ;;  %19 = sbr.rel (!%p17_p4) target bundleno = 5 (0x5), region = 81 }
 0x300   :  { %427 = vsyncpa [#allocation3], 1 }
 0x301   :  { %429 = vsyncpa [#allocation3 + $0x1], 1 }
 0x302   :  { %430 = vsyncpa [#allocation4], 1 }
 0x303   :  { %432 = vsyncpa [#allocation4 + $0x1], 1 }

</bundles_post_ra>
